<compile_context>
chip_gen: v5e
topology: v5e:2x2
jax: 0.10.0
libtpu: 0.0.40
codegen_flags: <defaults>
</compile_context>

<pallas_src>
import functools

import jax
import jax.numpy as jnp
from jax.experimental import pallas as pl
from jax.experimental.pallas import tpu as pltpu


# ----------------------------------------------------------------------------
# Kernel: both Q heads, full 3-layer MLP with Tanh, in one body.
# ----------------------------------------------------------------------------
def _twinned_q_kernel(obs_ref, act_ref, w1_ref, w2_ref, w3_ref, bias_ref,
                      out_ref):
    n1 = w1_ref.shape[1]   # 2 * mlp_dim[0]
    n2 = w2_ref.shape[1]   # 2 * mlp_dim[1]
    n3 = w3_ref.shape[1]   # 2  (q1 | q2)

    bias = bias_ref[...]   # (3, max(n1, n2, n3)) packed f32 biases

    # Layer 1: concat folded into the kernel (VMEM lane-concat), single K dot.
    x = jnp.concatenate([obs_ref[...], act_ref[...]], axis=-1)   # (tb, in) bf16
    h1 = jnp.tanh(
        jnp.dot(x, w1_ref[...], preferred_element_type=jnp.float32)
        + bias[0:1, :n1]
    )
    # Layer 2: block-diagonal fused weights keep the two heads independent.
    h2 = jnp.tanh(
        jnp.dot(h1.astype(w2_ref.dtype), w2_ref[...],
                preferred_element_type=jnp.float32)
        + bias[1:2, :n2]
    )
    # Layer 3: (2H2, 2) -> column 0 is q1, column 1 is q2.
    q = (jnp.dot(h2.astype(w3_ref.dtype), w3_ref[...],
                 preferred_element_type=jnp.float32)
         + bias[2:3, :n3])
    out_ref[...] = q.astype(out_ref.dtype)


# ----------------------------------------------------------------------------
# Parameter construction / fusion
# ----------------------------------------------------------------------------
def init_q_params(key, in_dim, mlp_dim):
    """PyTorch-Linear-style init: U(-1/sqrt(fan_in), 1/sqrt(fan_in)).

    Weights stored (in, out) so y = x @ W + b (== PyTorch's x @ W_pt.T + b).
    """
    dims = [in_dim] + list(mlp_dim) + [1]
    params = []
    for d_in, d_out in zip(dims[:-1], dims[1:]):
        key, kw, kb = jax.random.split(key, 3)
        bound = 1.0 / jnp.sqrt(jnp.float32(d_in))
        w = jax.random.uniform(kw, (d_in, d_out), jnp.float32, -bound, bound)
        b = jax.random.uniform(kb, (1, d_out), jnp.float32, -bound, bound)
        params += [w, b]
    return tuple(params), key


def fuse_twinned_params(params_q1, params_q2):
    """One-time prep: fuse the two heads' weights for the single-call kernel.

    Weights are cast to bfloat16 (MXU operands); biases stay f32 (added to the
    f32 accumulator inside the kernel).
    """
    w1a, b1a, w2a, b2a, w3a, b3a = params_q1
    w1b, b1b, w2b, b2b, w3b, b3b = params_q2
    h1 = w1a.shape[1]
    h2 = w2a.shape[1]

    # Layer 1: lane-concat -> (in_dim, 2*h1).  Kernel feeds concat(obs, act).
    w1 = jnp.concatenate([w1a, w1b], axis=1).astype(jnp.bfloat16)

    # Layer 2: block-diagonal -> (2*h1, 2*h2).
    z12 = jnp.zeros((h1, h2), jnp.float32)
    w2 = jnp.concatenate(
        [jnp.concatenate([w2a, z12], axis=1),
         jnp.concatenate([z12, w2b], axis=1)], axis=0).astype(jnp.bfloat16)

    # Layer 3: (2*h2, 2), column 0 <- head 1, column 1 <- head 2.
    w3 = jnp.concatenate(
        [jnp.concatenate([w3a, jnp.zeros_like(w3a)], axis=1),
         jnp.concatenate([jnp.zeros_like(w3b), w3b], axis=1)],
        axis=0).astype(jnp.bfloat16)

    # Pack all biases into one small f32 operand (fewer DMA descriptors).
    wmax = max(2 * h1, 2 * h2, 2)
    bias = jnp.zeros((3, wmax), jnp.float32)
    bias = bias.at[0, :2 * h1].set(jnp.concatenate([b1a, b1b], axis=1)[0])
    bias = bias.at[1, :2 * h2].set(jnp.concatenate([b2a, b2b], axis=1)[0])
    bias = bias.at[2, :2].set(jnp.concatenate([b3a, b3b], axis=1)[0])

    return (w1, w2, w3, bias)


# ----------------------------------------------------------------------------
# Batch tiling plan
# ----------------------------------------------------------------------------
def _plan_batch_tiling(batch, max_tile=2048):
    """Return (padded_batch, tile_b).

    tile_b is a multiple of 8 (or equals the full batch) capped at max_tile,
    prefers >= 2 grid steps (so v7x's two TensorCores both get work via the
    "parallel" grid axis), and pads the batch instead of degenerating to a
    huge single block or a tiny 8-row tile when the batch has no convenient
    divisor.
    """
    if batch <= 16 or (batch % 8 != 0 and batch <= max_tile):
        return batch, batch                       # single full block (legal)
    cap = min(max_tile, max(8, ((batch + 1) // 2) // 8 * 8))
    # Prefer an exact multiple-of-8 divisor (no padding needed).
    tile = cap
    while tile >= 128:
        if batch % tile == 0:
            return batch, tile
        tile -= 8
    # Fall back: pad the batch up to a multiple of a reasonably large tile.
    tile = min(cap, 1024)
    padded = -(-batch // tile) * tile
    return padded, tile


# ----------------------------------------------------------------------------
# Pure-XLA path for tiny batches (same fused params / same numerics).
# ----------------------------------------------------------------------------
def _forward_xla(obs_bf16, act_bf16, fused_params):
    w1, w2, w3, bias = fused_params
    n1, n2, n3 = w1.shape[1], w2.shape[1], w3.shape[1]
    x = jnp.concatenate([obs_bf16, act_bf16], axis=-1)
    h = jnp.tanh(jnp.dot(x, w1, preferred_element_type=jnp.float32)
                 + bias[0:1, :n1])
    h = jnp.tanh(jnp.dot(h.astype(w2.dtype), w2,
                         preferred_element_type=jnp.float32) + bias[1:2, :n2])
    q = (jnp.dot(h.astype(w3.dtype), w3, preferred_element_type=jnp.float32)
         + bias[2:3, :n3])
    return q[:, 0:1], q[:, 1:2]


# ----------------------------------------------------------------------------
# Wrapper
# ----------------------------------------------------------------------------
@functools.partial(jax.jit, static_argnames=("force_pallas",))
def twinned_q_forward(obsrv, action, fused_params, *, force_pallas=False):
    """TwinnedQNetwork.forward: returns (q1, q2), each (B, 1) float32."""
    w1, w2, w3, bias = fused_params
    batch, obs_dim = obsrv.shape
    act_dim = action.shape[1]
    n_out = w3.shape[1]   # 2

    obs = obsrv.astype(w1.dtype)   # bf16 operands, f32 accumulation in kernel
    act = action.astype(w1.dtype)

    if (not force_pallas) and batch < 128:
        # Tiny batch: pallas_call fixed overhead dominates; let XLA fuse it.
        return _forward_xla(obs, act, fused_params)

    padded_b, tile_b = _plan_batch_tiling(batch)
    if padded_b != batch:
        pad = padded_b - batch
        obs = jnp.pad(obs, ((0, pad), (0, 0)))
        act = jnp.pad(act, ((0, pad), (0, 0)))

    grid = (padded_b // tile_b,)

    out = pl.pallas_call(
        _twinned_q_kernel,
        out_shape=jax.ShapeDtypeStruct((padded_b, n_out), jnp.float32),
        grid=grid,
        in_specs=[
            pl.BlockSpec((tile_b, obs_dim), lambda b: (b, 0)),
            pl.BlockSpec((tile_b, act_dim), lambda b: (b, 0)),
            # Weights/biases: full blocks, constant index_map -> VMEM-resident
            # across batch tiles (no re-DMA per grid step).
            pl.BlockSpec(w1.shape, lambda b: (0, 0)),
            pl.BlockSpec(w2.shape, lambda b: (0, 0)),
            pl.BlockSpec(w3.shape, lambda b: (0, 0)),
            pl.BlockSpec(bias.shape, lambda b: (0, 0)),
        ],
        out_specs=pl.BlockSpec((tile_b, n_out), lambda b: (b, 0)),
        compiler_params=pltpu.CompilerParams(
            dimension_semantics=("parallel",),
        ),
    )(obs, act, w1, w2, w3, bias)

    out = out[:batch]
    # Module contract returns two (B, 1) tensors; the column slices are tiny.
    return out[:, 0:1], out[:, 1:2]


# ----------------------------------------------------------------------------
# Pure-JAX f32 reference (per head, unfused) for correctness checks.
# ----------------------------------------------------------------------------
def _reference(obsrv, action, params):
    w1, b1, w2, b2, w3, b3 = params
    x = jnp.concatenate([obsrv, action], axis=-1)
    h = jnp.tanh(x @ w1 + b1)
    h = jnp.tanh(h @ w2 + b2)
    return h @ w3 + b3


if __name__ == "__main__":
    # Shapes consistent with the module: obsrv_dim=8, action_dim=4, mlp_dim=[32,32].
    obsrv_dim, action_dim = 8, 4
    mlp_dim = [32, 32]

    key = jax.random.PRNGKey(0)
    params_q1, key = init_q_params(key, obsrv_dim + action_dim, mlp_dim)
    params_q2, key = init_q_params(key, obsrv_dim + action_dim, mlp_dim)
    fused = fuse_twinned_params(params_q1, params_q2)

    # bf16 operands + f32 accumulation -> loosen tolerances vs. the f32 reference.
    ATOL = 5e-2
    RTOL = 5e-2

    # --- Small test (batch=2): force the Pallas kernel path (single block). ---
    batch = 2
    key, k_obs, k_act = jax.random.split(key, 3)
    obsrv = jax.random.normal(k_obs, (batch, obsrv_dim), jnp.float32)
    action = jax.random.normal(k_act, (batch, action_dim), jnp.float32)

    q1, q2 = twinned_q_forward(obsrv, action, fused, force_pallas=True)
    q1 = jax.block_until_ready(q1)
    q2 = jax.block_until_ready(q2)

    r1 = _reference(obsrv, action, params_q1)
    r2 = _reference(obsrv, action, params_q2)
    assert q1.shape == (batch, 1) and q2.shape == (batch, 1)
    assert jnp.allclose(q1, r1, atol=ATOL, rtol=RTOL)
    assert jnp.allclose(q2, r2, atol=ATOL, rtol=RTOL)

    # --- Larger batch: exercises the batch-tiled, >=2-step "parallel" grid. ---
    batch2 = 1024
    key, k_obs2, k_act2 = jax.random.split(key, 3)
    obsrv2 = jax.random.normal(k_obs2, (batch2, obsrv_dim), jnp.float32)
    action2 = jax.random.normal(k_act2, (batch2, action_dim), jnp.float32)

    q1b, q2b = twinned_q_forward(obsrv2, action2, fused)
    q1b = jax.block_until_ready(q1b)
    q2b = jax.block_until_ready(q2b)

    r1b = _reference(obsrv2, action2, params_q1)
    r2b = _reference(obsrv2, action2, params_q2)
    assert q1b.shape == (batch2, 1) and q2b.shape == (batch2, 1)
    assert jnp.allclose(q1b, r1b, atol=ATOL, rtol=RTOL)
    assert jnp.allclose(q2b, r2b, atol=ATOL, rtol=RTOL)

    print("KERNEL_OK")
</pallas_src>

<mosaic_0001>
module attributes {stable_mosaic.version = 11 : i64} {
  func.func @_twinned_q_kernel(%arg0: i32, %arg1: memref<2x8xbf16, #tpu.memory_space<vmem>>, %arg2: memref<2x4xbf16, #tpu.memory_space<vmem>>, %arg3: memref<12x64xbf16, #tpu.memory_space<vmem>>, %arg4: memref<64x64xbf16, #tpu.memory_space<vmem>>, %arg5: memref<64x2xbf16, #tpu.memory_space<vmem>>, %arg6: memref<3x64xf32, #tpu.memory_space<vmem>>, %arg7: memref<2x2xf32, #tpu.memory_space<vmem>>) attributes {dimension_semantics = [#tpu.dimension_semantics<parallel>], iteration_bounds = array<i64: 1>, scalar_prefetch = 0 : i64, scratch_operands = 0 : i64, tpu.core_type = #tpu.core_type<tc>, window_params = [{transform_indices = @transform_0, window_bounds = array<i64: 2, 8>}, {transform_indices = @transform_1, window_bounds = array<i64: 2, 4>}, {pipeline_mode = #tpu.pipeline_mode<synchronous>, transform_indices = @transform_2, window_bounds = array<i64: 12, 64>}, {pipeline_mode = #tpu.pipeline_mode<synchronous>, transform_indices = @transform_3, window_bounds = array<i64: 64, 64>}, {pipeline_mode = #tpu.pipeline_mode<synchronous>, transform_indices = @transform_4, window_bounds = array<i64: 64, 2>}, {pipeline_mode = #tpu.pipeline_mode<synchronous>, transform_indices = @transform_5, window_bounds = array<i64: 3, 64>}, {transform_indices = @transform_6, window_bounds = array<i64: 2, 2>}]} {
    %c0 = arith.constant 0 : index
    %c0_0 = arith.constant 0 : index
    %0 = vector.load %arg6[%c0, %c0_0] : memref<3x64xf32, #tpu.memory_space<vmem>>, vector<3x64xf32>
    %c0_1 = arith.constant 0 : index
    %c0_2 = arith.constant 0 : index
    %1 = vector.load %arg1[%c0_1, %c0_2] : memref<2x8xbf16, #tpu.memory_space<vmem>>, vector<2x8xbf16>
    %c0_3 = arith.constant 0 : index
    %c0_4 = arith.constant 0 : index
    %2 = vector.load %arg2[%c0_3, %c0_4] : memref<2x4xbf16, #tpu.memory_space<vmem>>, vector<2x4xbf16>
    %3 = tpu.concatenate %1, %2 in 1 : vector<2x8xbf16>, vector<2x4xbf16> -> vector<2x12xbf16>
    %c0_5 = arith.constant 0 : index
    %c0_6 = arith.constant 0 : index
    %4 = vector.load %arg3[%c0_5, %c0_6] : memref<12x64xbf16, #tpu.memory_space<vmem>>, vector<12x64xbf16>
    %cst = arith.constant dense<0.000000e+00> : vector<2x64xf32>
    %5 = tpu.matmul %3, %4, %cst {dimension_numbers = #tpu.dot_dimension_numbers<[1], [0], [0], [1], [0, 0, 1, 1], [], []>} : vector<2x12xbf16>, vector<12x64xbf16>, vector<2x64xf32> -> vector<2x64xf32>
    %6 = vector.extract_strided_slice %0 {offsets = [0, 0], sizes = [1, 64], strides = [1, 1]} : vector<3x64xf32> to vector<1x64xf32>
    %7 = vector.broadcast %6 : vector<1x64xf32> to vector<2x64xf32>
    %8 = arith.addf %5, %7 : vector<2x64xf32>
    %9 = math.tanh %8 : vector<2x64xf32>
    %10 = arith.truncf %9 : vector<2x64xf32> to vector<2x64xbf16>
    %c0_7 = arith.constant 0 : index
    %c0_8 = arith.constant 0 : index
    %11 = vector.load %arg4[%c0_7, %c0_8] : memref<64x64xbf16, #tpu.memory_space<vmem>>, vector<64x64xbf16>
    %cst_9 = arith.constant dense<0.000000e+00> : vector<2x64xf32>
    %12 = tpu.matmul %10, %11, %cst_9 {dimension_numbers = #tpu.dot_dimension_numbers<[1], [0], [0], [1], [0, 0, 1, 1], [], []>} : vector<2x64xbf16>, vector<64x64xbf16>, vector<2x64xf32> -> vector<2x64xf32>
    %13 = vector.extract_strided_slice %0 {offsets = [1, 0], sizes = [1, 64], strides = [1, 1]} : vector<3x64xf32> to vector<1x64xf32>
    %14 = vector.broadcast %13 : vector<1x64xf32> to vector<2x64xf32>
    %15 = arith.addf %12, %14 : vector<2x64xf32>
    %16 = math.tanh %15 : vector<2x64xf32>
    %17 = arith.truncf %16 : vector<2x64xf32> to vector<2x64xbf16>
    %c0_10 = arith.constant 0 : index
    %c0_11 = arith.constant 0 : index
    %18 = vector.load %arg5[%c0_10, %c0_11] : memref<64x2xbf16, #tpu.memory_space<vmem>>, vector<64x2xbf16>
    %cst_12 = arith.constant dense<0.000000e+00> : vector<2x2xf32>
    %19 = tpu.matmul %17, %18, %cst_12 {dimension_numbers = #tpu.dot_dimension_numbers<[1], [0], [0], [1], [0, 0, 1, 1], [], []>} : vector<2x64xbf16>, vector<64x2xbf16>, vector<2x2xf32> -> vector<2x2xf32>
    %20 = vector.extract_strided_slice %0 {offsets = [2, 0], sizes = [1, 2], strides = [1, 1]} : vector<3x64xf32> to vector<1x2xf32>
    %21 = vector.broadcast %20 : vector<1x2xf32> to vector<2x2xf32>
    %22 = arith.addf %19, %21 : vector<2x2xf32>
    %c0_13 = arith.constant 0 : index
    %c0_14 = arith.constant 0 : index
    %23 = vector.load %arg7[%c0_13, %c0_14] : memref<2x2xf32, #tpu.memory_space<vmem>>, vector<2x2xf32>
    tpu.vector_store %arg7[%c0_13, %c0_14], %22 {strides = array<i32>} : memref<2x2xf32, #tpu.memory_space<vmem>>, vector<2x2xf32>,
    return
  }
  func.func @transform_0(%arg0: i32) -> (i32, i32) {
    %c0_i32 = arith.constant 0 : i32
    %c0_i32_0 = arith.constant 0 : i32
    return %arg0, %c0_i32 : i32, i32
  }
  func.func @transform_1(%arg0: i32) -> (i32, i32) {
    %c0_i32 = arith.constant 0 : i32
    %c0_i32_0 = arith.constant 0 : i32
    return %arg0, %c0_i32 : i32, i32
  }
  func.func @transform_2(%arg0: i32) -> (i32, i32) {
    %c0_i32 = arith.constant 0 : i32
    %c0_i32_0 = arith.constant 0 : i32
    %c0_i32_1 = arith.constant 0 : i32
    return %c0_i32, %c0_i32_0 : i32, i32
  }
  func.func @transform_3(%arg0: i32) -> (i32, i32) {
    %c0_i32 = arith.constant 0 : i32
    %c0_i32_0 = arith.constant 0 : i32
    %c0_i32_1 = arith.constant 0 : i32
    return %c0_i32, %c0_i32_0 : i32, i32
  }
  func.func @transform_4(%arg0: i32) -> (i32, i32) {
    %c0_i32 = arith.constant 0 : i32
    %c0_i32_0 = arith.constant 0 : i32
    %c0_i32_1 = arith.constant 0 : i32
    return %c0_i32, %c0_i32_0 : i32, i32
  }
  func.func @transform_5(%arg0: i32) -> (i32, i32) {
    %c0_i32 = arith.constant 0 : i32
    %c0_i32_0 = arith.constant 0 : i32
    %c0_i32_1 = arith.constant 0 : i32
    return %c0_i32, %c0_i32_0 : i32, i32
  }
  func.func @transform_6(%arg0: i32) -> (i32, i32) {
    %c0_i32 = arith.constant 0 : i32
    %c0_i32_0 = arith.constant 0 : i32
    return %arg0, %c0_i32 : i32, i32
  }
}

</mosaic_0001>

<bundles_post_ra>
// kernel: twinned_q_forward.1
= control target key start
LH: loop header
LB: loop body
LE: loop exit
PB: predicated region body
PF: predicated region fallthrough
CT: control target
= control target key end

     0   :  { %11 = vsyncpa [#allocation3], 0  ;;  %s273_s24 = smov [#allocation2]   ;;  %s274_s26 = smov 64   ;;  %s353_s0 = inlined_call_operand.vmem [shape: bf16[2,8], index: 0, kind: input, shape index: {}]   ;;  %s354_s1 = inlined_call_operand.vmem [shape: bf16[2,4], index: 1, kind: input, shape index: {}]   ;;  %s355_s2 = inlined_call_operand.hbm [shape: bf16[12,64], index: 2, kind: input, shape index: {}]   ;;  %s356_s3 = inlined_call_operand.vmem [shape: bf16[64,64], index: 3, kind: input, shape index: {}]   ;;  %s357_s4 = inlined_call_operand.vmem [shape: bf16[64,2], index: 4, kind: input, shape index: {}]   ;;  %s358_s5 = inlined_call_operand.vmem [shape: f32[3,64], index: 5, kind: input, shape index: {}]   ;;  %s359_s6 = inlined_call_operand.vmem [shape: f32[2,2], index: 6, kind: output, shape index: {}]  }
   0x1   :  { %s20_s23 = sshll.u32 %s355_s2, 4  ;;  %s22_s25 = sshll.u32 %s273_s24, 4  ;;  %s21_s23 = int_to_ptr.hbm [resolvable:$true] %s20_s23  ;;  %s23_s25 = int_to_ptr.vmem [resolvable:$true] %s22_s25 }
   0x2   :  { %s275_s27 = smov 4  }
   0x3   :  { %28 = dma.hbm_to_vmem [thread:$0]  %s21_s23, 128, %s23_s25, [#allocation3], %s274_s26, %s274_s26, %s275_s27  }
   0x4   :  { %271 = dma.done.wait [#allocation3], 128  }
   0x5   :  { %272 = vsyncadd [#allocation3], 4294967168  ;;  %vm64_vm0 = vcmask 1045504   ;;  %v42_v0 = vld [vmem:[%s354_s1] sm:$0x1]  ;;  %s276_s2 = smov 8  }
   0x6   :  { %v193_v1 = vld [vmem:[#allocation2] sm:$0xf]  ;;  %v230_v2 = vld [vmem:[#allocation2] sm:$0x30]  ;;  %44 = vst [vmem:[#allocation1] ss:$9 sm:$0xff] %v42_v0 }
   0x7   :  { %v194_v3 = vor.u32 %v230_v2, %v193_v1  ;;  %v234_v6 = vld [vmem:[%s356_s3 + $0x18] sm:$0xff]  ;;  %v41_v7 = vld [vmem:[%s353_s0] sm:$0x1]  ;;  %vm49_vm1 = vcmask 64512   ;;  %vm61_vm2 = vcmask 97280   ;;  %v233_v10 = vld [vmem:[%s356_s3 + $0x10] sm:$0xff] }
   0x8   :  { %124 = vmatpush.bf16.msra.mxu1 %v234_v6  ;;  %v232_v11 = vld [vmem:[%s356_s3 + $0x8] sm:$0xff]  ;;  %v231_v12 = vld [vmem:[%s356_s3] sm:$0xff]  ;;  %v238_v13 = vld [vmem:[%s357_s4 + $0x18] sm:$0xff]  ;;  %vm116_vm3 = vcmask 523264   ;;  %vm184_vm4 = vcmask 9216  }
   0x9   :  { %v66_v4 = vsel %vm64_vm0, %v194_v3, 0  ;;  %175 = vmatpush.bf16.msra.mxu2 %v238_v13  ;;  %v40_v14 = vld [vmem:[%s358_s5] sm:$0x7]  ;;  %v237_v21 = vld [vmem:[%s357_s4 + $0x10] sm:$0xff]  ;;  %v236_v22 = vld [vmem:[%s357_s4 + $0x8] sm:$0xff] }
   0xa   :  { %75 = vmatpush.bf16.msra.mxu0 %v66_v4  ;;  %v55_v15 = vperm.slane %v40_v14, 0  ;;  %v235_v23 = vld [vmem:[%s357_s4] sm:$0xff]  ;;  %v91_v24 = vperm.slane %v40_v14, 1  ;;  %v143_v30 = vperm.slane %v40_v14, 2 }
   0xc   :  { %125 = vmatpush.bf16.msra.mxu1 %v233_v10 }
   0xd   :  { %v45_v5 = vld [vmem:[#allocation1] sm:$0xff]  ;;  %176 = vmatpush.bf16.msra.mxu2 %v237_v21 }
   0xe   :  { %47 = vrot.lane.b32.xlu0 %v45_v5, %s276_s2 }
  0x10   :  { %126 = vmatpush.bf16.msra.mxu1 %v232_v11 }
  0x11   :  { %177 = vmatpush.bf16.msra.mxu2 %v236_v22 }
  0x14   :  { %127 = vmatpush.bf16.msra.mxu1 %v231_v12 }
  0x15   :  { %178 = vmatpush.bf16.msra.mxu2 %v235_v23 }
  0x80   :  { %v48_v8 = vpop.permute.xlu0 %47 }
  0x81   :  { %v52_v9 = vsel %vm49_vm1, %v41_v7, %v48_v8 }
  0x82   :  { %195 = vmatmul.msk.bf16.vlgmr.msra.gmra.mxu0 %vm61_vm2, %v52_v9 }
  0xff   :  { %v77_v16 = vpop.f32.mrf.mxu0 }
 0x100   :  { %v78_v17 = vadd.f32 %v77_v16, %v55_v15 }
 0x102   :  { %243 = vtanh.f32 %v78_v17 }
 0x107   :  { %v79_v18 = vpop.f32.mrf.mxu0 }
 0x108   :  { %v244_v19 = vpop.eup %243 }
 0x109   :  { %v82_v20 = vpack.c.bf16 %v244_v19, %v244_v19 }
 0x10b   :  { %212 = vmatmul.msk.bf16.vlgmr.msra.gmra.mxu1 %vm116_vm3, %v82_v20 }
 0x188   :  { %v129_v25 = vpop.f32.mrf.mxu1 }
 0x189   :  { %v130_v26 = vadd.f32 %v129_v25, %v91_v24 }
 0x18b   :  { %245 = vtanh.f32 %v130_v26 }
 0x190   :  { %v131_v27 = vpop.f32.mrf.mxu1 }
 0x191   :  { %v246_v28 = vpop.eup %245 }
 0x192   :  { %v134_v29 = vpack.c.bf16 %v246_v28, %v246_v28 }
 0x194   :  { %229 = vmatmul.msk.bf16.vlgmr.msra.gmra.mxu2 %vm116_vm3, %v134_v29 }
 0x217   :  { %v180_v31 = vpop.f32.mrf.mxu2 }
 0x218   :  { %v181_v32 = vadd.f32 %v180_v31, %v143_v30 }
 0x21a   :  { %185 = vst.msk [vmem:[%s359_s6] sm:$0x3] %vm184_vm4, %v181_v32 }
 0x21f   :  { %v182_v33 = vpop.f32.mrf.mxu2 }
 0x220   :  { %190 = vsyncpa [#allocation3], 1 }

</bundles_post_ra>
